<compile_context>
chip_gen: v7x
topology: tpu7x:2x2x1
jax: 0.10.0
libtpu: 0.0.40
codegen_flags: <defaults>
</compile_context>

<pallas_src>
import functools
import math

import jax
import jax.numpy as jnp
from jax.experimental import pallas as pl
from jax.experimental.pallas import tpu as pltpu


LANE = 128  # TPU lane width; all column dims padded to this for dense layouts.


# ------------------------------ fused kernel -------------------------------

def _mixhop_fused_kernel(adj_ref, x_ref, w_ref, bh_ref, o_ref, *,
                         layers_1, layers_2):
    adj = adj_ref[...]                                    # (N, N) f32, loaded once
    n = adj.shape[0]
    col = jax.lax.broadcasted_iota(jnp.int32, (n, LANE), 1)

    # ---- upper (SparseNGCN) block: wide projection (bias folded via the ----
    # ---- ones-column of x_ref) + relu + shared adjacency hops --------------
    h = jnp.dot(x_ref[...], w_ref[:, 0:LANE],
                preferred_element_type=jnp.float32)       # (N, 128) f32
    h = jnp.maximum(h, 0.0)
    z1 = h
    cur = h
    boundary = layers_1[0]
    for width in layers_1[1:]:                            # unrolled, short
        cur = jnp.dot(adj, cur, preferred_element_type=jnp.float32)
        z1 = jnp.where(col >= boundary, cur, z1)          # slice k gets A^k @ h
        boundary += width

    # ---- bottom (DenseNGCN) block ------------------------------------------
    g = jnp.dot(z1, w_ref[:, LANE:2 * LANE],
                preferred_element_type=jnp.float32)       # (N, 128) f32
    z2 = g
    cur = g
    boundary = layers_2[0]
    for width in layers_2[1:]:
        cur = jnp.dot(adj, cur, preferred_element_type=jnp.float32)
        z2 = jnp.where(col >= boundary, cur, z2)
        boundary += width
    # NOTE: the DenseNGCN bias (added after the hops in the reference) is
    # folded exactly into bh_ref as bb @ W_fc, since the FC head is z2's only
    # consumer:  (z2 + bb) @ W_fc + b_fc == z2 @ W_fc + (bb @ W_fc + b_fc).

    # ---- head: 128-lane-padded f32 logits; padded lanes have bias -1e30 ----
    logits = jnp.dot(z2, w_ref[:, 2 * LANE:3 * LANE],
                     preferred_element_type=jnp.float32)  # (N, 128) f32
    logits = logits + bh_ref[...]
    m = jnp.max(logits, axis=1, keepdims=True)
    lse = jnp.log(jnp.sum(jnp.exp(logits - m), axis=1, keepdims=True)) + m
    o_ref[...] = logits - lse                             # log_softmax, lane-dense


# -------------------------- one-time operand packing ------------------------

def prepare_mixhop_operands(params, features, adj_dense, layers_1, layers_2,
                            class_number):
    """Pre-folds all parameter prep (concat / pad / bias folds) once."""
    a1 = sum(layers_1)
    a2 = sum(layers_2)
    n, f = features.shape
    assert class_number <= LANE, "head padding scheme requires C <= 128"
    assert f + 1 <= LANE and a1 <= LANE and a2 <= LANE

    # Augmented features: [X | 1 | 0-pad] -> the ones column folds the upper
    # bias into the upper weight slab.
    x_aug = jnp.zeros((n, LANE), jnp.float32)
    x_aug = x_aug.at[:, :f].set(features.astype(jnp.float32))
    x_aug = x_aug.at[:, f].set(1.0)

    wu = jnp.concatenate([w for (w, _) in params["upper"]], axis=1)    # (F, A1)
    bu = jnp.concatenate([b for (_, b) in params["upper"]], axis=1)    # (1, A1)
    wb = jnp.concatenate([w for (w, _) in params["bottom"]], axis=1)   # (A1, A2)
    bb = jnp.concatenate([b for (_, b) in params["bottom"]], axis=1)   # (1, A2)
    w_fc, b_fc = params["fc"]                                          # (A2,C),(1,C)

    # Single weight slab: [ W_upper' | W_bottom | W_fc ], each block (128, 128),
    # zero-padded.  Row F of the upper block carries the upper bias.
    w_slab = jnp.zeros((LANE, 3 * LANE), jnp.float32)
    w_slab = w_slab.at[:f, :a1].set(wu)
    w_slab = w_slab.at[f, :a1].set(bu[0])
    w_slab = w_slab.at[:a1, LANE:LANE + a2].set(wb)
    w_slab = w_slab.at[:a2, 2 * LANE:2 * LANE + class_number].set(w_fc)

    # Head bias row: real classes get b_fc + (bottom bias folded through the
    # head), padded lanes get -1e30 so exp() == 0 in the f32 softmax.
    b_head = jnp.full((1, LANE), -1e30, jnp.float32)
    b_head = b_head.at[:, :class_number].set(b_fc + bb @ w_fc)

    return adj_dense.astype(jnp.float32), x_aug, w_slab, b_head


# ------------------------------ jitted forward ------------------------------

@functools.partial(jax.jit,
                   static_argnames=("layers_1", "layers_2", "class_number"))
def mixhop_forward(adj, x_aug, w_slab, b_head, *, layers_1, layers_2,
                   class_number):
    n = x_aug.shape[0]
    kernel = functools.partial(_mixhop_fused_kernel,
                               layers_1=tuple(layers_1),
                               layers_2=tuple(layers_2))
    vmem = pl.BlockSpec(memory_space=pltpu.MemorySpace.VMEM)
    out = pl.pallas_call(
        kernel,
        out_shape=jax.ShapeDtypeStruct((n, LANE), jnp.float32),
        in_specs=[vmem] * 4,
        out_specs=vmem,
    )(adj, x_aug, w_slab, b_head)
    return out[:, :class_number]


# ------------------------------ parameter init ------------------------------

def xavier_uniform(key, shape):
    fan_in, fan_out = shape[0], shape[1]
    bound = math.sqrt(6.0 / (fan_in + fan_out))
    return jax.random.uniform(key, shape, jnp.float32, -bound, bound)


def init_mixhop_params(key, feature_number, class_number, layers_1, layers_2):
    abstract_1 = sum(layers_1)
    params = {"upper": [], "bottom": []}
    keys = jax.random.split(key, 2 * len(layers_1) + 2 * len(layers_2) + 2)
    k = 0
    for out_c in layers_1:
        w = xavier_uniform(keys[k], (feature_number, out_c)); k += 1
        b = xavier_uniform(keys[k], (1, out_c)); k += 1
        params["upper"].append((w, b))
    for out_c in layers_2:
        w = xavier_uniform(keys[k], (abstract_1, out_c)); k += 1
        b = xavier_uniform(keys[k], (1, out_c)); k += 1
        params["bottom"].append((w, b))
    # torch nn.Linear default init (kaiming-uniform weight, uniform bias).
    abstract_2 = sum(layers_2)
    fc_bound = 1.0 / math.sqrt(abstract_2)
    w_fc = jax.random.uniform(keys[k], (abstract_2, class_number), jnp.float32,
                              -fc_bound, fc_bound); k += 1
    b_fc = jax.random.uniform(keys[k], (1, class_number), jnp.float32,
                              -fc_bound, fc_bound)
    params["fc"] = (w_fc, b_fc)
    return params


# ----------------------------- pure-JAX reference ---------------------------

def mixhop_reference(params, features, adj, layers_1, layers_2):
    ups = []
    for i, (w, b) in enumerate(params["upper"]):
        h = jnp.maximum(features @ w + b, 0.0)
        for _ in range(i):                       # iterations = i + 1 -> i hops
            h = adj @ h
        ups.append(h)
    z1 = jnp.concatenate(ups, axis=1)
    bots = []
    for i, (w, b) in enumerate(params["bottom"]):
        h = z1 @ w
        for _ in range(i):
            h = adj @ h
        bots.append(h + b)
    z2 = jnp.concatenate(bots, axis=1)
    w_fc, b_fc = params["fc"]
    return jax.nn.log_softmax(z2 @ w_fc + b_fc, axis=1)


# --------------------------------- driver ----------------------------------

if __name__ == "__main__":
    key = jax.random.PRNGKey(0)
    k_feat, k_adj, k_params = jax.random.split(key, 3)

    # Small graph: N nodes, F input features, 3+3 MixHop layers, C classes.
    num_nodes = 64
    feature_number = 32
    class_number = 8
    layers_1 = (16, 16, 16)   # args.layers_1
    layers_2 = (16, 16, 16)   # args.layers_2
    # args.dropout = 0.0 (eval mode) -> dropout is identity.

    # Dense feature matrix (stands in for the sparse feature dict).
    features = jax.random.normal(k_feat, (num_nodes, feature_number),
                                 jnp.float32)

    # Symmetrically-normalized adjacency with self loops, materialized densely.
    a = (jax.random.uniform(k_adj, (num_nodes, num_nodes)) < 0.1).astype(
        jnp.float32)
    a = jnp.maximum(a, a.T) + jnp.eye(num_nodes, dtype=jnp.float32)
    a = jnp.minimum(a, 1.0)
    deg_inv_sqrt = 1.0 / jnp.sqrt(jnp.sum(a, axis=1))
    adj_dense = deg_inv_sqrt[:, None] * a * deg_inv_sqrt[None, :]

    params = init_mixhop_params(k_params, feature_number, class_number,
                                layers_1, layers_2)

    # One-time prep (concat / pad / bias folds); per-call path is jitted.
    adj_op, x_aug, w_slab, b_head = prepare_mixhop_operands(
        params, features, adj_dense, layers_1, layers_2, class_number)

    preds = mixhop_forward(adj_op, x_aug, w_slab, b_head,
                           layers_1=layers_1, layers_2=layers_2,
                           class_number=class_number)
    preds = jax.block_until_ready(preds)

    assert preds.shape == (num_nodes, class_number)
    # log_softmax rows must sum to ~1 in probability space (computed in f32).
    assert bool(jnp.all(jnp.abs(jnp.sum(jnp.exp(preds), axis=1) - 1.0) < 1e-3))
    # Sanity-check the fused kernel against a straightforward JAX reference.
    ref = mixhop_reference(params, features, adj_dense, layers_1, layers_2)
    assert bool(jnp.max(jnp.abs(preds - ref)) < 5e-2)
    print("KERNEL_OK")
</pallas_src>

<mosaic_0001>
module attributes {stable_mosaic.version = 11 : i64} {
  func.func @_mixhop_fused_kernel(%arg0: memref<64x64xf32, #tpu.memory_space<vmem>>, %arg1: memref<64x128xf32, #tpu.memory_space<vmem>>, %arg2: memref<128x384xf32, #tpu.memory_space<vmem>>, %arg3: memref<1x128xf32, #tpu.memory_space<vmem>>, %arg4: memref<64x128xf32, #tpu.memory_space<vmem>>) attributes {dimension_semantics = [], scalar_prefetch = 0 : i64, scratch_operands = 0 : i64, tpu.core_type = #tpu.core_type<tc>} {
    %c0 = arith.constant 0 : index
    %c0_0 = arith.constant 0 : index
    %0 = vector.load %arg0[%c0, %c0_0] : memref<64x64xf32, #tpu.memory_space<vmem>>, vector<64x64xf32>
    %1 = tpu.iota {dimensions = array<i32: 1>} : vector<64x128xi32>
    %c0_1 = arith.constant 0 : index
    %c0_2 = arith.constant 0 : index
    %2 = vector.load %arg1[%c0_1, %c0_2] : memref<64x128xf32, #tpu.memory_space<vmem>>, vector<64x128xf32>
    %c0_3 = arith.constant 0 : index
    %c0_4 = arith.constant 0 : index
    %3 = vector.load %arg2[%c0_3, %c0_4] : memref<128x384xf32, #tpu.memory_space<vmem>>, vector<128x128xf32>
    %cst = arith.constant dense<0.000000e+00> : vector<64x128xf32>
    %4 = tpu.matmul %2, %3, %cst {dimension_numbers = #tpu.dot_dimension_numbers<[1], [0], [0], [1], [0, 0, 1, 1], [], []>} : vector<64x128xf32>, vector<128x128xf32>, vector<64x128xf32> -> vector<64x128xf32>
    %cst_5 = arith.constant 0.000000e+00 : f32
    %5 = vector.broadcast %cst_5 : f32 to vector<64x128xf32>
    %6 = arith.maximumf %4, %5 : vector<64x128xf32>
    %cst_6 = arith.constant dense<0.000000e+00> : vector<64x128xf32>
    %7 = tpu.matmul %0, %6, %cst_6 {dimension_numbers = #tpu.dot_dimension_numbers<[1], [0], [0], [1], [0, 0, 1, 1], [], []>} : vector<64x64xf32>, vector<64x128xf32>, vector<64x128xf32> -> vector<64x128xf32>
    %c16_i32 = arith.constant 16 : i32
    %8 = vector.broadcast %c16_i32 : i32 to vector<64x128xi32>
    %9 = arith.cmpi sge, %1, %8 : vector<64x128xi32>
    %10 = arith.select %9, %7, %6 : vector<64x128xi1>, vector<64x128xf32>
    %cst_7 = arith.constant dense<0.000000e+00> : vector<64x128xf32>
    %11 = tpu.matmul %0, %7, %cst_7 {dimension_numbers = #tpu.dot_dimension_numbers<[1], [0], [0], [1], [0, 0, 1, 1], [], []>} : vector<64x64xf32>, vector<64x128xf32>, vector<64x128xf32> -> vector<64x128xf32>
    %c32_i32 = arith.constant 32 : i32
    %12 = vector.broadcast %c32_i32 : i32 to vector<64x128xi32>
    %13 = arith.cmpi sge, %1, %12 : vector<64x128xi32>
    %14 = arith.select %13, %11, %10 : vector<64x128xi1>, vector<64x128xf32>
    %c0_8 = arith.constant 0 : index
    %c128 = arith.constant 128 : index
    %15 = vector.load %arg2[%c0_8, %c128] : memref<128x384xf32, #tpu.memory_space<vmem>>, vector<128x128xf32>
    %cst_9 = arith.constant dense<0.000000e+00> : vector<64x128xf32>
    %16 = tpu.matmul %14, %15, %cst_9 {dimension_numbers = #tpu.dot_dimension_numbers<[1], [0], [0], [1], [0, 0, 1, 1], [], []>} : vector<64x128xf32>, vector<128x128xf32>, vector<64x128xf32> -> vector<64x128xf32>
    %cst_10 = arith.constant dense<0.000000e+00> : vector<64x128xf32>
    %17 = tpu.matmul %0, %16, %cst_10 {dimension_numbers = #tpu.dot_dimension_numbers<[1], [0], [0], [1], [0, 0, 1, 1], [], []>} : vector<64x64xf32>, vector<64x128xf32>, vector<64x128xf32> -> vector<64x128xf32>
    %c16_i32_11 = arith.constant 16 : i32
    %18 = vector.broadcast %c16_i32_11 : i32 to vector<64x128xi32>
    %19 = arith.cmpi sge, %1, %18 : vector<64x128xi32>
    %20 = arith.select %19, %17, %16 : vector<64x128xi1>, vector<64x128xf32>
    %cst_12 = arith.constant dense<0.000000e+00> : vector<64x128xf32>
    %21 = tpu.matmul %0, %17, %cst_12 {dimension_numbers = #tpu.dot_dimension_numbers<[1], [0], [0], [1], [0, 0, 1, 1], [], []>} : vector<64x64xf32>, vector<64x128xf32>, vector<64x128xf32> -> vector<64x128xf32>
    %c32_i32_13 = arith.constant 32 : i32
    %22 = vector.broadcast %c32_i32_13 : i32 to vector<64x128xi32>
    %23 = arith.cmpi sge, %1, %22 : vector<64x128xi32>
    %24 = arith.select %23, %21, %20 : vector<64x128xi1>, vector<64x128xf32>
    %c0_14 = arith.constant 0 : index
    %c256 = arith.constant 256 : index
    %25 = vector.load %arg2[%c0_14, %c256] : memref<128x384xf32, #tpu.memory_space<vmem>>, vector<128x128xf32>
    %cst_15 = arith.constant dense<0.000000e+00> : vector<64x128xf32>
    %26 = tpu.matmul %24, %25, %cst_15 {dimension_numbers = #tpu.dot_dimension_numbers<[1], [0], [0], [1], [0, 0, 1, 1], [], []>} : vector<64x128xf32>, vector<128x128xf32>, vector<64x128xf32> -> vector<64x128xf32>
    %c0_16 = arith.constant 0 : index
    %c0_17 = arith.constant 0 : index
    %27 = vector.load %arg3[%c0_16, %c0_17] : memref<1x128xf32, #tpu.memory_space<vmem>>, vector<1x128xf32>
    %28 = vector.broadcast %27 : vector<1x128xf32> to vector<64x128xf32>
    %29 = arith.addf %26, %28 : vector<64x128xf32>
    %cst_18 = arith.constant dense<0xFF800000> : vector<64xf32>
    %30 = vector.multi_reduction <maximumf>, %29, %cst_18 [1] : vector<64x128xf32> to vector<64xf32>
    %31 = vector.shape_cast %30 : vector<64xf32> to vector<64x1xf32>
    %32 = vector.broadcast %31 : vector<64x1xf32> to vector<64x128xf32>
    %33 = arith.subf %29, %32 : vector<64x128xf32>
    %34 = math.exp %33 : vector<64x128xf32>
    %cst_19 = arith.constant dense<0.000000e+00> : vector<64xf32>
    %35 = vector.multi_reduction <add>, %34, %cst_19 [1] : vector<64x128xf32> to vector<64xf32>
    %36 = vector.shape_cast %35 : vector<64xf32> to vector<64x1xf32>
    %37 = math.log %36 : vector<64x1xf32>
    %38 = arith.addf %37, %31 : vector<64x1xf32>
    %39 = vector.broadcast %38 : vector<64x1xf32> to vector<64x128xf32>
    %40 = arith.subf %29, %39 : vector<64x128xf32>
    %c0_20 = arith.constant 0 : index
    %c0_21 = arith.constant 0 : index
    %41 = vector.load %arg4[%c0_20, %c0_21] : memref<64x128xf32, #tpu.memory_space<vmem>>, vector<64x128xf32>
    tpu.vector_store %arg4[%c0_20, %c0_21], %40 {strides = array<i32>} : memref<64x128xf32, #tpu.memory_space<vmem>>, vector<64x128xf32>,
    return
  }
}

</mosaic_0001>

<bundles_post_ra>
// kernel: mixhop_forward.1
= control target key start
LH: loop header
LB: loop body
LE: loop exit
PB: predicated region body
PF: predicated region fallthrough
CT: control target
= control target key end

     0   :  { %9 = vsyncpa [#allocation3], 0  ;;  %s2157_s0 = inlined_call_operand.hbm [shape: f32[64,64], index: 0, kind: input, shape index: {}]   ;;  %s2158_s1 = inlined_call_operand.hbm [shape: f32[64,128], index: 1, kind: input, shape index: {}]   ;;  %s2159_s2 = inlined_call_operand.hbm [shape: f32[128,384], index: 2, kind: input, shape index: {}]   ;;  %s2160_s3 = inlined_call_operand.vmem [shape: f32[1,128], index: 3, kind: input, shape index: {}]   ;;  %s2161_s4 = inlined_call_operand.vmem [shape: f32[64,128], index: 4, kind: output, shape index: {}]  }
   0x1   :  { %10 = vsyncpa [#allocation5], 0  ;;  %s1733_s15 = smov [#allocation4]   ;;  %s1734_s17 = smov [#allocation2]  }
   0x2   :  { %s28_s16 = sshll.u32 %s1733_s15, 4  ;;  %s16_s18 = sshll.u32 %s1734_s17, 4  ;;  %s29_s16 = int_to_ptr.vmem [resolvable:$true] %s28_s16  ;;  %s1765_s18 = int_to_ptr.vmem [resolvable:$true] %s16_s18 }
   0x3   :  { %s1663_s21 = scalar_lea.hbm %s2158_s1, 1024 }
   0x4   :  { %p1664_p0 = scmp.ne.s32.totalorder %s2158_s1, %s1663_s21  ;;  %p1667_p1 = scmp.lt.u32.totalorder %s1663_s21, %s2158_s1 }
   0x6   :  { %p1669_p2 = pnand %p1667_p1, %p1664_p0 }
   0x8   :  { %1672 = shalt.err (!%p1669_p2)
}
   0x9   :  { %s1673_s26 = scalar_lea.vmem %s29_s16, 1024  ;;  %p1678_p4 = scmp.lt.s32.totalorder %s29_s16, %s29_s16 }
   0xa   :  { %p1674_p3 = scmp.ne.s32.totalorder %s29_s16, %s1673_s26  ;;  %p1679_p5 = scmp.lt.s32.totalorder %s1673_s26, %s1673_s26 }
   0xc   :  { %p1680_p6 = por %p1679_p5, %p1678_p4 }
   0xe   :  { %p1681_p7 = pnand %p1680_p6, %p1674_p3 }
  0x10   :  { %1684 = shalt.err (!%p1681_p7)
}
  0x11   :  { %s1735_s27 = smov 128   ;;  %s1736_s28 = smov 8  }
  0x12   :  { %34 = dma.hbm_to_vmem [thread:$0]  %s2158_s1, 1024, %s29_s16, [#allocation5], %s1735_s27, %s1735_s27, %s1736_s28  }
  0x13   :  { %s1685_s7 = scalar_lea.hbm %s2157_s0, 1024 }
  0x14   :  { %p1686_p8 = scmp.ne.s32.totalorder %s2157_s0, %s1685_s7  ;;  %p1689_p9 = scmp.lt.u32.totalorder %s1685_s7, %s2157_s0 }
  0x16   :  { %p1691_p10 = pnand %p1689_p9, %p1686_p8 }
  0x18   :  { %1694 = shalt.err (!%p1691_p10)
}
  0x19   :  { %s1695_s12 = scalar_lea.vmem %s1765_s18, 1024  ;;  %p1700_p12 = scmp.lt.s32.totalorder %s1765_s18, %s1765_s18 }
  0x1a   :  { %p1696_p11 = scmp.ne.s32.totalorder %s1765_s18, %s1695_s12  ;;  %p1701_p13 = scmp.lt.s32.totalorder %s1695_s12, %s1695_s12 }
  0x1c   :  { %p1702_p0 = por %p1701_p13, %p1700_p12 }
  0x1e   :  { %p1703_p1 = pnand %p1702_p0, %p1696_p11 }
  0x20   :  { %1706 = shalt.err (!%p1703_p1)
}
  0x21   :  { %22 = dma.hbm_to_vmem [thread:$0]  %s2157_s0, 1024, %s1765_s18, [#allocation3], %s1735_s27, %s1735_s27, %s1736_s28  }
  0x22   :  { %s1737_s14 = smov [#allocation6]   ;;  %s1707_s19 = scalar_lea.hbm %s2159_s2, 6144 }
  0x23   :  { %s40_s15 = sshll.u32 %s1737_s14, 4  ;;  %p1708_p2 = scmp.ne.s32.totalorder %s2159_s2, %s1707_s19  ;;  %s41_s15 = int_to_ptr.vmem [resolvable:$true] %s40_s15 }
  0x24   :  { %p1711_p3 = scmp.lt.u32.totalorder %s1707_s19, %s2159_s2 }
  0x26   :  { %p1713_p4 = pnand %p1711_p3, %p1708_p2 }
  0x28   :  { %1716 = shalt.err (!%p1713_p4)
}
  0x29   :  { %s1717_s24 = scalar_lea.vmem %s41_s15, 6144  ;;  %p1722_p6 = scmp.lt.s32.totalorder %s41_s15, %s41_s15 }
  0x2a   :  { %p1718_p5 = scmp.ne.s32.totalorder %s41_s15, %s1717_s24  ;;  %p1723_p7 = scmp.lt.s32.totalorder %s1717_s24, %s1717_s24 }
  0x2c   :  { %p1724_p8 = por %p1723_p7, %p1722_p6 }
  0x2e   :  { %p1725_p9 = pnand %p1724_p8, %p1718_p5 }
  0x30   :  { %1728 = shalt.err (!%p1725_p9)
}
  0x31   :  { %s1738_s0 = smov 384   ;;  %s1739_s18 = smov 24  }
  0x32   :  { %46 = dma.hbm_to_vmem [thread:$0]  %s2159_s2, 6144, %s41_s15, [#allocation5], %s1738_s0, %s1738_s0, %s1739_s18  }
  0x33   :  { %1729 = dma.done.wait [#allocation3], 1024  }
  0x34   :  { %1730 = vsyncadd [#allocation3], 4294966272 }
  0x35   :  { %1731 = dma.done.wait [#allocation5], 7168  }
  0x36   :  { %1732 = vsyncadd [#allocation5], 4294960128  ;;  %v76_v0 = vld [vmem:[#allocation6] sm:$0xff]  ;;  %v77_v1 = vld [vmem:[#allocation6 + $0x18] sm:$0xff]  ;;  %vm205_vm0 = vcmask 523264  }
  0x37   :  { %v78_v2 = vld [vmem:[#allocation6 + $0x30] sm:$0xff]  ;;  %v1448_v3 = vpack.c.bf16 %v77_v1, %v76_v0  ;;  %v79_v4 = vld [vmem:[#allocation6 + $0x48] sm:$0xff]  ;;  %v80_v6 = vld [vmem:[#allocation6 + $0x60] sm:$0xff] }
  0x38   :  { %v1452_v5 = vpack.c.bf16 %v79_v4, %v78_v2  ;;  %v81_v7 = vld [vmem:[#allocation6 + $0x78] sm:$0xff]  ;;  %v68_v9 = vld [vmem:[#allocation4] sm:$0xff]  ;;  %v82_v10 = vld [vmem:[#allocation6 + $0x90] sm:$0xff] }
  0x39   :  { %1449 = vmatprep.subr.bf16.mxu0 %v1448_v3  ;;  %v1456_v8 = vpack.c.bf16 %v81_v7, %v80_v6  ;;  %v83_v11 = vld [vmem:[#allocation6 + $0xa8] sm:$0xff]  ;;  %1236 = vmatprep.mubr.f32.mxu0 %v68_v9  ;;  %v84_v13 = vld [vmem:[#allocation6 + $0xc0] sm:$0xff]  ;;  %v85_v14 = vld [vmem:[#allocation6 + $0xd8] sm:$0xff] }
  0x3a   :  { %1451 = vmatpush3.bf16.msra.mxu0 %v1448_v3  ;;  %v1460_v12 = vpack.c.bf16 %v83_v11, %v82_v10  ;;  %v1464_v15 = vpack.c.bf16 %v85_v14, %v84_v13  ;;  %v86_v16 = vld [vmem:[#allocation6 + $0xf0] sm:$0xff]  ;;  %v87_v17 = vld [vmem:[#allocation6 + $0x108] sm:$0xff]  ;;  %v88_v19 = vld [vmem:[#allocation6 + $0x120] sm:$0xff] }
  0x3b   :  { %1453 = vmatprep.subr.bf16.mxu0 %v1452_v5  ;;  %v1468_v18 = vpack.c.bf16 %v87_v17, %v86_v16  ;;  %v89_v20 = vld [vmem:[#allocation6 + $0x138] sm:$0xff]  ;;  %v90_v22 = vld [vmem:[#allocation6 + $0x150] sm:$0xff]  ;;  %v91_v23 = vld [vmem:[#allocation6 + $0x168] sm:$0xff] }
  0x3c   :  { %v1472_v21 = vpack.c.bf16 %v89_v20, %v88_v19  ;;  %v1476_v24 = vpack.c.bf16 %v91_v23, %v90_v22  ;;  %v69_v25 = vld [vmem:[#allocation4 + $0x8] sm:$0xff]  ;;  %v70_v26 = vld [vmem:[#allocation4 + $0x10] sm:$0xff]  ;;  %v71_v27 = vld [vmem:[#allocation4 + $0x18] sm:$0xff] }
  0x3d   :  { %v72_v28 = vld [vmem:[#allocation4 + $0x20] sm:$0xff]  ;;  %v73_v29 = vld [vmem:[#allocation4 + $0x28] sm:$0xff]  ;;  %v74_v30 = vld [vmem:[#allocation4 + $0x30] sm:$0xff] }
  0x3e   :  { %1455 = vmatpush3.bf16.msra.mxu0 %v1452_v5  ;;  %v75_v31 = vld [vmem:[#allocation4 + $0x38] sm:$0xff]  ;;  %v1808_v32 = vld [vmem:[#allocation2] sm:$0xff]  ;;  %v1852_v53 = vld [vmem:[#allocation2 + $0x8] sm:$0xff] }
  0x3f   :  { %1457 = vmatprep.subr.bf16.mxu0 %v1456_v8  ;;  %1264 = vmatprep.mubr.msk.f32.mxu1 %vm205_vm0, %v1808_v32  ;;  %v1854_v54 = vld [vmem:[#allocation2 + $0x10] sm:$0xff]  ;;  %v1860_v55 = vld [vmem:[#allocation2 + $0x18] sm:$0xff]  ;;  %v1862_v56 = vld [vmem:[#allocation2 + $0x20] sm:$0xff] }
  0x40   :  { %v1868_v57 = vld [vmem:[#allocation2 + $0x28] sm:$0xff]  ;;  %v1870_v58 = vld [vmem:[#allocation2 + $0x30] sm:$0xff]  ;;  %v1876_v59 = vld [vmem:[#allocation2 + $0x38] sm:$0xff] }
  0x41   :  { %v458_v60 = vld [vmem:[#allocation6 + $0x8] sm:$0xff]  ;;  %v459_v61 = vld [vmem:[#allocation6 + $0x20] sm:$0xff]  ;;  %v460_v62 = vld [vmem:[#allocation6 + $0x38] sm:$0xff] }
  0x42   :  { %1459 = vmatpush3.bf16.msra.mxu0 %v1456_v8  ;;  %v1512_v63 = vpack.c.bf16 %v459_v61, %v458_v60  ;;  %v461_v0 = vld [vmem:[#allocation6 + $0x50] sm:$0xff]  ;;  %v462_v2 = vld [vmem:[#allocation6 + $0x68] sm:$0xff]  ;;  %v463_v3 = vld [vmem:[#allocation6 + $0x80] sm:$0xff] }
  0x43   :  { %1461 = vmatprep.subr.bf16.mxu0 %v1460_v12  ;;  %v1516_v1 = vpack.c.bf16 %v461_v0, %v460_v62  ;;  %v1520_v4 = vpack.c.bf16 %v463_v3, %v462_v2  ;;  %v464_v5 = vld [vmem:[#allocation6 + $0x98] sm:$0xff]  ;;  %v465_v6 = vld [vmem:[#allocation6 + $0xb0] sm:$0xff]  ;;  %v466_v8 = vld [vmem:[#allocation6 + $0xc8] sm:$0xff] }
  0x44   :  { %v1524_v7 = vpack.c.bf16 %v465_v6, %v464_v5  ;;  %v467_v9 = vld [vmem:[#allocation6 + $0xe0] sm:$0xff]  ;;  %v468_v11 = vld [vmem:[#allocation6 + $0xf8] sm:$0xff]  ;;  %v470_v14 = vld [vmem:[#allocation6 + $0x128] sm:$0xff] }
  0x45   :  { %v1528_v10 = vpack.c.bf16 %v467_v9, %v466_v8 }
  0x46   :  { %1463 = vmatpush3.bf16.msra.mxu0 %v1460_v12  ;;  %v469_v12 = vld [vmem:[#allocation6 + $0x110] sm:$0xff] }
  0x47   :  { %1465 = vmatprep.subr.bf16.mxu0 %v1464_v15  ;;  %v1532_v13 = vpack.c.bf16 %v469_v12, %v468_v11 }
  0x4a   :  { %1467 = vmatpush3.bf16.msra.mxu0 %v1464_v15  ;;  %v471_v15 = vld [vmem:[#allocation6 + $0x140] sm:$0xff] }
  0x4b   :  { %1469 = vmatprep.subr.bf16.mxu0 %v1468_v18  ;;  %v1536_v16 = vpack.c.bf16 %v471_v15, %v470_v14  ;;  %v805_v14 = vld [vmem:[#allocation6 + $0x10] sm:$0xff]  ;;  %v806_v15 = vld [vmem:[#allocation6 + $0x28] sm:$0xff] }
  0x4e   :  { %1471 = vmatpush3.bf16.msra.mxu0 %v1468_v18 }
  0x4f   :  { %1473 = vmatprep.subr.bf16.mxu0 %v1472_v21 }
  0x52   :  { %1475 = vmatpush3.bf16.msra.mxu0 %v1472_v21 }
  0x53   :  { %1477 = vmatprep.subr.bf16.mxu0 %v1476_v24 }
  0x56   :  { %1479 = vmatpush3.bf16.msra.mxu0 %v1476_v24 }
  0x57   :  { %1513 = vmatprep.subr.bf16.mxu0 %v1512_v63 }
  0x59   :  { %1237 = vmatmul.mubr.f32.vlgmr.msra.gmra.mrb[0].mxu0 %v69_v25 }
  0x5a   :  { %1239 = vmatprep.mubr.f32.mxu0 %v70_v26  ;;  %1515 = vmatpush3.bf16.msra.mxu0 %v1512_v63 }
  0x5b   :  { %1517 = vmatprep.subr.bf16.mxu0 %v1516_v1 }
  0x5d   :  { %1240 = vmatmul.mubr.f32.gmra.mrb[2].mxu0 %v71_v27 }
  0x5e   :  { %1242 = vmatprep.mubr.f32.mxu0 %v72_v28  ;;  %1519 = vmatpush3.bf16.msra.mxu0 %v1516_v1 }
  0x5f   :  { %1521 = vmatprep.subr.bf16.mxu0 %v1520_v4 }
  0x61   :  { %1243 = vmatmul.mubr.f32.gmra.mrb[4].mxu0 %v73_v29  ;;  %v472_v29 = vld [vmem:[#allocation6 + $0x158] sm:$0xff] }
  0x62   :  { %1245 = vmatprep.mubr.f32.mxu0 %v74_v30  ;;  %1523 = vmatpush3.bf16.msra.mxu0 %v1520_v4  ;;  %v473_v30 = vld [vmem:[#allocation6 + $0x170] sm:$0xff] }
  0x63   :  { %1525 = vmatprep.subr.bf16.mxu0 %v1524_v7 }
  0x65   :  { %1246 = vmatmul.mubr.f32.gmra.mrb[6].mxu0 %v75_v31  ;;  %v1540_v31 = vpack.c.bf16 %v473_v30, %v472_v29  ;;  %v816_v29 = vld [vmem:[#allocation6 + $0x118] sm:$0xff] }
  0x66   :  { %1527 = vmatpush3.bf16.msra.mxu0 %v1524_v7 }
  0x67   :  { %1529 = vmatprep.subr.bf16.mxu0 %v1528_v10 }
  0x6a   :  { %1531 = vmatpush3.bf16.msra.mxu0 %v1528_v10 }
  0x6b   :  { %1533 = vmatprep.subr.bf16.mxu0 %v1532_v13 }
  0x6e   :  { %1535 = vmatpush3.bf16.msra.mxu0 %v1532_v13 }
  0x6f   :  { %1537 = vmatprep.subr.bf16.mxu0 %v1536_v16 }
  0x72   :  { %1539 = vmatpush3.bf16.msra.mxu0 %v1536_v16  ;;  %v807_v16 = vld [vmem:[#allocation6 + $0x40] sm:$0xff] }
  0x73   :  { %1541 = vmatprep.subr.bf16.mxu0 %v1540_v31 }
  0x76   :  { %1543 = vmatpush3.bf16.msra.mxu0 %v1540_v31  ;;  %v817_v31 = vld [vmem:[#allocation6 + $0x130] sm:$0xff] }
 0x12c   :  { %v1812_v33 = vpop.f32.mrb[0].mxu0 }
 0x12d   :  { %v198_v34 = vmax.f32 %v1812_v33, 0.0  ;;  %v1815_v35 = vpop.f32.mrb[1].mxu0 }
 0x12e   :  { %v197_v36 = vmax.f32 %v1815_v35, 0.0 }
 0x130   :  { %v1818_v37 = vpop.f32.mrb[2].mxu0  ;;  %v1480_v38 = vpack.c.bf16 %v198_v34, %v197_v36 }
 0x131   :  { %v200_v39 = vmax.f32 %v1818_v37, 0.0  ;;  %v1825_v40 = vpop.f32.mrb[3].mxu0 }
 0x132   :  { %v199_v41 = vmax.f32 %v1825_v40, 0.0  ;;  %1481 = vmatprep.subr.bf16.mxu1 %v1480_v38 }
 0x133   :  { %1483 = vmatpush3.bf16.msra.mxu1 %v1480_v38  ;;  %v66_v38 = vlaneseq }
 0x134   :  { %v1484_v42 = vpack.c.bf16 %v200_v39, %v199_v41  ;;  %v1832_v43 = vpop.f32.mrb[4].mxu0 }
 0x135   :  { %v202_v44 = vmax.f32 %v1832_v43, 0.0  ;;  %v1835_v45 = vpop.f32.mrb[5].mxu0 }
 0x136   :  { %v201_v46 = vmax.f32 %v1835_v45, 0.0  ;;  %1485 = vmatprep.subr.bf16.mxu1 %v1484_v42 }
 0x137   :  { %1487 = vmatpush3.bf16.msra.mxu1 %v1484_v42  ;;  %v1898_v42 = vand.u32 127, %v66_v38  ;;  %v818_v38 = vld [vmem:[#allocation6 + $0x148] sm:$0xff] }
 0x138   :  { %v1488_v47 = vpack.c.bf16 %v202_v44, %v201_v46  ;;  %v1842_v48 = vpop.f32.mrb[6].mxu0 }
 0x139   :  { %v204_v49 = vmax.f32 %v1842_v48, 0.0  ;;  %v1845_v50 = vpop.f32.mrb[7].mxu0  ;;  %vm335_vm1 = vcmp.ge.s32.totalorder %v1898_v42, 16  ;;  %vm449_vm2 = vcmp.ge.s32.totalorder %v1898_v42, 32 }
 0x13a   :  { %v203_v51 = vmax.f32 %v1845_v50, 0.0  ;;  %1489 = vmatprep.subr.bf16.mxu1 %v1488_v47 }
 0x13b   :  { %1491 = vmatpush3.bf16.msra.mxu1 %v1488_v47 }
 0x13c   :  { %v1492_v52 = vpack.c.bf16 %v204_v49, %v203_v51 }
 0x13e   :  { %1493 = vmatprep.subr.bf16.mxu1 %v1492_v52 }
 0x13f   :  { %1495 = vmatpush3.bf16.msra.mxu1 %v1492_v52 }
 0x142   :  { %1265 = vmatmul.mubr.msk.f32.vlgmr.msra.gmra.mrb[0].mxu1 %vm205_vm0, %v1852_v53 }
 0x143   :  { %1267 = vmatprep.mubr.msk.f32.mxu1 %vm205_vm0, %v1854_v54 }
 0x146   :  { %1268 = vmatmul.mubr.msk.f32.gmra.mrb[2].mxu1 %vm205_vm0, %v1860_v55 }
 0x147   :  { %1270 = vmatprep.mubr.msk.f32.mxu1 %vm205_vm0, %v1862_v56 }
 0x14a   :  { %1271 = vmatmul.mubr.msk.f32.gmra.mrb[4].mxu1 %vm205_vm0, %v1868_v57 }
 0x14b   :  { %1273 = vmatprep.mubr.msk.f32.mxu1 %vm205_vm0, %v1870_v58 }
 0x14e   :  { %1274 = vmatmul.mubr.msk.f32.gmra.mrb[6].mxu1 %vm205_vm0, %v1876_v59 }
 0x14f   :  { %1292 = vmatprep.mubr.msk.f32.mxu1 %vm205_vm0, %v1808_v32 }
 0x215   :  { %v1266_v17 = vpop.f32.mrb[0].mxu1 }
 0x216   :  { %v296_v18 = vpop.f32.mrb[1].mxu1  ;;  %v337_v47 = vsel %vm335_vm1, %v1266_v17, %v198_v34 }
 0x217   :  { %v1496_v19 = vpack.c.bf16 %v1266_v17, %v296_v18  ;;  %v336_v60 = vsel %vm335_vm1, %v296_v18, %v197_v36  ;;  %v1990_v17 = vpack.c.bf16 %v806_v15, %v805_v14  ;;  %v808_v18 = vld [vmem:[#allocation6 + $0x58] sm:$0xff] }
 0x219   :  { %v1269_v20 = vpop.f32.mrb[2].mxu1  ;;  %1497 = vmatprep.subr.bf16.mxu1 %v1496_v19  ;;  %1577 = vmatprep.subr.bf16.mxu0 %v1990_v17 }
 0x21a   :  { %v306_v21 = vpop.f32.mrb[3].mxu1  ;;  %1499 = vmatpush3.bf16.msra.mxu1 %v1496_v19  ;;  %v339_v33 = vsel %vm335_vm1, %v1269_v20, %v200_v39  ;;  %v1992_v19 = vpack.c.bf16 %v808_v18, %v807_v16 }
 0x21b   :  { %v1500_v22 = vpack.c.bf16 %v1269_v20, %v306_v21  ;;  %v338_v35 = vsel %vm335_vm1, %v306_v21, %v199_v41  ;;  %v809_v20 = vld [vmem:[#allocation6 + $0x70] sm:$0xff]  ;;  %v810_v21 = vld [vmem:[#allocation6 + $0x88] sm:$0xff] }
 0x21d   :  { %v1272_v23 = vpop.f32.mrb[4].mxu1  ;;  %1501 = vmatprep.subr.bf16.mxu1 %v1500_v22 }
 0x21e   :  { %v316_v24 = vpop.f32.mrb[5].mxu1  ;;  %1503 = vmatpush3.bf16.msra.mxu1 %v1500_v22  ;;  %v341_v37 = vsel %vm335_vm1, %v1272_v23, %v202_v44  ;;  %v1997_v22 = vpack.c.bf16 %v810_v21, %v809_v20 }
 0x21f   :  { %v1504_v25 = vpack.c.bf16 %v1272_v23, %v316_v24  ;;  %v340_v40 = vsel %vm335_vm1, %v316_v24, %v201_v46  ;;  %v811_v23 = vld [vmem:[#allocation6 + $0xa0] sm:$0xff] }
 0x221   :  { %v1275_v26 = vpop.f32.mrb[6].mxu1  ;;  %1505 = vmatprep.subr.bf16.mxu1 %v1504_v25 }
 0x222   :  { %v326_v27 = vpop.f32.mrb[7].mxu1  ;;  %1507 = vmatpush3.bf16.msra.mxu1 %v1504_v25  ;;  %v343_v43 = vsel %vm335_vm1, %v1275_v26, %v204_v49  ;;  %v813_v25 = vld [vmem:[#allocation6 + $0xd0] sm:$0xff] }
 0x223   :  { %v1508_v28 = vpack.c.bf16 %v1275_v26, %v326_v27  ;;  %v342_v45 = vsel %vm335_vm1, %v326_v27, %v203_v51  ;;  %v814_v26 = vld [vmem:[#allocation6 + $0xe8] sm:$0xff] }
 0x224   :  { %v1592_v27 = vpack.c.bf16 %v814_v26, %v813_v25 }
 0x225   :  { %1509 = vmatprep.subr.bf16.mxu1 %v1508_v28 }
 0x226   :  { %1511 = vmatpush3.bf16.msra.mxu1 %v1508_v28  ;;  %v815_v28 = vld [vmem:[#allocation6 + $0x100] sm:$0xff] }
 0x227   :  { %v1596_v30 = vpack.c.bf16 %v816_v29, %v815_v28 }
 0x229   :  { %1293 = vmatmul.mubr.msk.f32.vlgmr.msra.gmra.mrb[8].mxu1 %vm205_vm0, %v1852_v53 }
 0x22a   :  { %1295 = vmatprep.mubr.msk.f32.mxu1 %vm205_vm0, %v1854_v54 }
 0x22d   :  { %1296 = vmatmul.mubr.msk.f32.gmra.mrb[10].mxu1 %vm205_vm0, %v1860_v55 }
 0x22e   :  { %1298 = vmatprep.mubr.msk.f32.mxu1 %vm205_vm0, %v1862_v56 }
 0x231   :  { %1299 = vmatmul.mubr.msk.f32.gmra.mrb[12].mxu1 %vm205_vm0, %v1868_v57 }
 0x232   :  { %1301 = vmatprep.mubr.msk.f32.mxu1 %vm205_vm0, %v1870_v58 }
 0x235   :  { %1302 = vmatmul.mubr.msk.f32.gmra.mrb[14].mxu1 %vm205_vm0, %v1876_v59 }
 0x236   :  { %1364 = vmatprep.mubr.msk.f32.mxu1 %vm205_vm0, %v1808_v32 }
 0x2fc   :  { %v1294_v52 = vpop.f32.mrb[8].mxu1 }
 0x2fd   :  { %v451_v61 = vsel %vm449_vm2, %v1294_v52, %v337_v47  ;;  %v410_v62 = vpop.f32.mrb[9].mxu1  ;;  %v1600_v47 = vpack.c.bf16 %v818_v38, %v817_v31 }
 0x2fe   :  { %v450_v63 = vsel %vm449_vm2, %v410_v62, %v336_v60 }
 0x2ff   :  { %1336 = vmatprep.mubr.f32.mxu0 %v450_v63 }
 0x300   :  { %v1297_v34 = vpop.f32.mrb[10].mxu1  ;;  %1337 = vmatmul.mubr.f32.vlgmr.msra.gmra.mrb[8].mxu0 %v451_v61 }
 0x301   :  { %v420_v36 = vpop.f32.mrb[11].mxu1  ;;  %v453_v0 = vsel %vm449_vm2, %v1297_v34, %v339_v33  ;;  %1579 = vmatpush3.bf16.msra.mxu0 %v1990_v17 }
 0x302   :  { %v452_v1 = vsel %vm449_vm2, %v420_v36, %v338_v35  ;;  %1581 = vmatprep.subr.bf16.mxu0 %v1992_v19 }
 0x303   :  { %1339 = vmatprep.mubr.f32.mxu0 %v452_v1 }
 0x304   :  { %v1300_v39 = vpop.f32.mrb[12].mxu1  ;;  %1340 = vmatmul.mubr.f32.gmra.mrb[10].mxu0 %v453_v0 }
 0x305   :  { %v430_v41 = vpop.f32.mrb[13].mxu1  ;;  %v455_v2 = vsel %vm449_vm2, %v1300_v39, %v341_v37  ;;  %1583 = vmatpush3.bf16.msra.mxu0 %v1992_v19 }
 0x306   :  { %v454_v3 = vsel %vm449_vm2, %v430_v41, %v340_v40  ;;  %1585 = vmatprep.subr.bf16.mxu0 %v1997_v22 }
 0x307   :  { %1342 = vmatprep.mubr.f32.mxu0 %v454_v3 }
 0x308   :  { %v1303_v44 = vpop.f32.mrb[14].mxu1  ;;  %1343 = vmatmul.mubr.f32.gmra.mrb[12].mxu0 %v455_v2 }
 0x309   :  { %v440_v46 = vpop.f32.mrb[15].mxu1  ;;  %v457_v4 = vsel %vm449_vm2, %v1303_v44, %v343_v43  ;;  %1587 = vmatpush3.bf16.msra.mxu0 %v1997_v22 }
 0x30a   :  { %v456_v5 = vsel %vm449_vm2, %v440_v46, %v342_v45 }
 0x30b   :  { %1345 = vmatprep.mubr.f32.mxu0 %v456_v5 }
 0x30c   :  { %1346 = vmatmul.mubr.f32.gmra.mrb[14].mxu0 %v457_v4 }
 0x3d3   :  { %v1950_v48 = vpop.f32.mrb[8].mxu0 }
 0x3d4   :  { %v1952_v6 = vpop.f32.mrb[9].mxu0 }
 0x3d5   :  { %v1544_v49 = vpack.c.bf16 %v1950_v48, %v1952_v6 }
 0x3d7   :  { %v1956_v50 = vpop.f32.mrb[10].mxu0  ;;  %1545 = vmatprep.subr.bf16.mxu1 %v1544_v49 }
 0x3d8   :  { %v1958_v51 = vpop.f32.mrb[11].mxu0  ;;  %1547 = vmatpush3.bf16.msra.mxu1 %v1544_v49 }
 0x3d9   :  { %v1548_v7 = vpack.c.bf16 %v1956_v50, %v1958_v51 }
 0x3db   :  { %v1962_v8 = vpop.f32.mrb[12].mxu0  ;;  %1549 = vmatprep.subr.bf16.mxu1 %v1548_v7 }
 0x3dc   :  { %v1964_v9 = vpop.f32.mrb[13].mxu0  ;;  %1551 = vmatpush3.bf16.msra.mxu1 %v1548_v7 }
 0x3dd   :  { %v1552_v10 = vpack.c.bf16 %v1962_v8, %v1964_v9 }
 0x3df   :  { %v1968_v11 = vpop.f32.mrb[14].mxu0  ;;  %1553 = vmatprep.subr.bf16.mxu1 %v1552_v10 }
 0x3e0   :  { %v1970_v12 = vpop.f32.mrb[15].mxu0  ;;  %1555 = vmatpush3.bf16.msra.mxu1 %v1552_v10 }
 0x3e1   :  { %v1556_v13 = vpack.c.bf16 %v1968_v11, %v1970_v12 }
 0x3e3   :  { %1557 = vmatprep.subr.bf16.mxu1 %v1556_v13 }
 0x3e4   :  { %1559 = vmatpush3.bf16.msra.mxu1 %v1556_v13 }
 0x3e7   :  { %1365 = vmatmul.mubr.msk.f32.vlgmr.msra.gmra.mrb[16].mxu1 %vm205_vm0, %v1852_v53 }
 0x3e8   :  { %1367 = vmatprep.mubr.msk.f32.mxu1 %vm205_vm0, %v1854_v54 }
 0x3eb   :  { %1368 = vmatmul.mubr.msk.f32.gmra.mrb[18].mxu1 %vm205_vm0, %v1860_v55 }
 0x3ec   :  { %1370 = vmatprep.mubr.msk.f32.mxu1 %vm205_vm0, %v1862_v56 }
 0x3ef   :  { %1371 = vmatmul.mubr.msk.f32.gmra.mrb[20].mxu1 %vm205_vm0, %v1868_v57 }
 0x3f0   :  { %1373 = vmatprep.mubr.msk.f32.mxu1 %vm205_vm0, %v1870_v58 }
 0x3f3   :  { %1374 = vmatmul.mubr.msk.f32.gmra.mrb[22].mxu1 %vm205_vm0, %v1876_v59 }
 0x3f4   :  { %1392 = vmatprep.mubr.msk.f32.mxu1 %vm205_vm0, %v1808_v32  ;;  %v812_v32 = vld [vmem:[#allocation6 + $0xb8] sm:$0xff] }
 0x3f5   :  { %v1588_v24 = vpack.c.bf16 %v812_v32, %v811_v23 }
 0x3f7   :  { %1589 = vmatprep.subr.bf16.mxu0 %v1588_v24 }
 0x3f8   :  { %1591 = vmatpush3.bf16.msra.mxu0 %v1588_v24 }
 0x3f9   :  { %1593 = vmatprep.subr.bf16.mxu0 %v1592_v27 }
 0x3fc   :  { %1595 = vmatpush3.bf16.msra.mxu0 %v1592_v27 }
 0x3fd   :  { %1597 = vmatprep.subr.bf16.mxu0 %v1596_v30 }
 0x400   :  { %1599 = vmatpush3.bf16.msra.mxu0 %v1596_v30 }
 0x401   :  { %1601 = vmatprep.subr.bf16.mxu0 %v1600_v47 }
 0x404   :  { %1603 = vmatpush3.bf16.msra.mxu0 %v1600_v47 }
 0x4ba   :  { %v1366_v52 = vpop.f32.mrb[16].mxu1 }
 0x4bb   :  { %v685_v60 = vsel %vm335_vm1, %v1366_v52, %v1950_v48  ;;  %v645_v61 = vpop.f32.mrb[17].mxu1 }
 0x4bc   :  { %v684_v62 = vsel %vm335_vm1, %v645_v61, %v1952_v6  ;;  %v1560_v63 = vpack.c.bf16 %v1366_v52, %v645_v61 }
 0x4be   :  { %v1369_v33 = vpop.f32.mrb[18].mxu1  ;;  %1561 = vmatprep.subr.bf16.mxu1 %v1560_v63 }
 0x4bf   :  { %v687_v34 = vsel %vm335_vm1, %v1369_v33, %v1956_v50  ;;  %v655_v35 = vpop.f32.mrb[19].mxu1  ;;  %1563 = vmatpush3.bf16.msra.mxu1 %v1560_v63 }
 0x4c0   :  { %v686_v36 = vsel %vm335_vm1, %v655_v35, %v1958_v51  ;;  %v1564_v0 = vpack.c.bf16 %v1369_v33, %v655_v35 }
 0x4c2   :  { %v1372_v1 = vpop.f32.mrb[20].mxu1  ;;  %1565 = vmatprep.subr.bf16.mxu1 %v1564_v0 }
 0x4c3   :  { %v689_v37 = vsel %vm335_vm1, %v1372_v1, %v1962_v8  ;;  %v665_v39 = vpop.f32.mrb[21].mxu1  ;;  %1567 = vmatpush3.bf16.msra.mxu1 %v1564_v0 }
 0x4c4   :  { %v688_v40 = vsel %vm335_vm1, %v665_v39, %v1964_v9  ;;  %v1568_v41 = vpack.c.bf16 %v1372_v1, %v665_v39 }
 0x4c6   :  { %v1375_v2 = vpop.f32.mrb[22].mxu1  ;;  %1569 = vmatprep.subr.bf16.mxu1 %v1568_v41 }
 0x4c7   :  { %v691_v3 = vsel %vm335_vm1, %v1375_v2, %v1968_v11  ;;  %v675_v43 = vpop.f32.mrb[23].mxu1  ;;  %1571 = vmatpush3.bf16.msra.mxu1 %v1568_v41  ;;  %v1067_v11 = vld [vmem:[%s2160_s3] ss:$0 sm:$0xff] }
 0x4c8   :  { %v690_v44 = vsel %vm335_vm1, %v675_v43, %v1970_v12  ;;  %v1572_v45 = vpack.c.bf16 %v1375_v2, %v675_v43 }
 0x4ca   :  { %1573 = vmatprep.subr.bf16.mxu1 %v1572_v45 }
 0x4cb   :  { %1575 = vmatpush3.bf16.msra.mxu1 %v1572_v45 }
 0x4cc   :  { %1608 = vmatprep.subr.bf16.mxu1 %v1990_v17 }
 0x4ce   :  { %1393 = vmatmul.mubr.msk.f32.vlgmr.msra.gmra.mrb[24].mxu1 %vm205_vm0, %v1852_v53  ;;  %v819_v53 = vld [vmem:[#allocation6 + $0x160] sm:$0xff] }
 0x4cf   :  { %1395 = vmatprep.mubr.msk.f32.mxu1 %vm205_vm0, %v1854_v54  ;;  %1616 = vmatpush3.bf16.msra.mxu1 %v1990_v17  ;;  %v820_v54 = vld [vmem:[#allocation6 + $0x178] sm:$0xff] }
 0x4d0   :  { %1609 = vmatprep.subr.bf16.mxu1 %v1992_v19 }
 0x4d2   :  { %1396 = vmatmul.mubr.msk.f32.gmra.mrb[26].mxu1 %vm205_vm0, %v1860_v55  ;;  %v1604_v55 = vpack.c.bf16 %v820_v54, %v819_v53 }
 0x4d3   :  { %1398 = vmatprep.mubr.msk.f32.mxu1 %vm205_vm0, %v1862_v56  ;;  %1617 = vmatpush3.bf16.msra.mxu1 %v1992_v19 }
 0x4d4   :  { %1610 = vmatprep.subr.bf16.mxu1 %v1997_v22  ;;  %1605 = vmatprep.subr.bf16.mxu0 %v1604_v55 }
 0x4d5   :  { %1607 = vmatpush3.bf16.msra.mxu0 %v1604_v55 }
 0x4d6   :  { %1399 = vmatmul.mubr.msk.f32.gmra.mrb[28].mxu1 %vm205_vm0, %v1868_v57 }
 0x4d7   :  { %1401 = vmatprep.mubr.msk.f32.mxu1 %vm205_vm0, %v1870_v58  ;;  %1618 = vmatpush3.bf16.msra.mxu1 %v1997_v22 }
 0x4d8   :  { %1611 = vmatprep.subr.bf16.mxu1 %v1588_v24 }
 0x4da   :  { %1402 = vmatmul.mubr.msk.f32.gmra.mrb[30].mxu1 %vm205_vm0, %v1876_v59 }
 0x4db   :  { %1619 = vmatpush3.bf16.msra.mxu1 %v1588_v24 }
 0x4dc   :  { %1612 = vmatprep.subr.bf16.mxu1 %v1592_v27 }
 0x4df   :  { %1620 = vmatpush3.bf16.msra.mxu1 %v1592_v27 }
 0x4e0   :  { %1613 = vmatprep.subr.bf16.mxu1 %v1596_v30 }
 0x4e3   :  { %1621 = vmatpush3.bf16.msra.mxu1 %v1596_v30 }
 0x4e4   :  { %1614 = vmatprep.subr.bf16.mxu1 %v1600_v47 }
 0x4e7   :  { %1622 = vmatpush3.bf16.msra.mxu1 %v1600_v47 }
 0x4e8   :  { %1615 = vmatprep.subr.bf16.mxu1 %v1604_v55 }
 0x4eb   :  { %1623 = vmatpush3.bf16.msra.mxu1 %v1604_v55 }
 0x5a1   :  { %v1394_v56 = vpop.f32.mrb[24].mxu1 }
 0x5a2   :  { %v798_v57 = vsel %vm449_vm2, %v1394_v56, %v685_v60  ;;  %v758_v58 = vpop.f32.mrb[25].mxu1 }
 0x5a3   :  { %v797_v59 = vsel %vm449_vm2, %v758_v58, %v684_v62 }
 0x5a4   :  { %1436 = vmatprep.mubr.f32.mxu0 %v797_v59 }
 0x5a5   :  { %v1397_v46 = vpop.f32.mrb[26].mxu1  ;;  %1437 = vmatmul.mubr.f32.vlgmr.msra.gmra.mrb[16].mxu0 %v798_v57 }
 0x5a6   :  { %v768_v4 = vpop.f32.mrb[27].mxu1  ;;  %v800_v5 = vsel %vm449_vm2, %v1397_v46, %v687_v34 }
 0x5a7   :  { %v799_v48 = vsel %vm449_vm2, %v768_v4, %v686_v36 }
 0x5a8   :  { %1439 = vmatprep.mubr.f32.mxu0 %v799_v48 }
 0x5a9   :  { %v1400_v6 = vpop.f32.mrb[28].mxu1  ;;  %1440 = vmatmul.mubr.f32.gmra.mrb[18].mxu0 %v800_v5 }
 0x5aa   :  { %v802_v49 = vsel %vm449_vm2, %v1400_v6, %v689_v37  ;;  %v778_v50 = vpop.f32.mrb[29].mxu1 }
 0x5ab   :  { %v801_v51 = vsel %vm449_vm2, %v778_v50, %v688_v40 }
 0x5ac   :  { %1442 = vmatprep.mubr.f32.mxu1 %v801_v51 }
 0x5ad   :  { %v1403_v7 = vpop.f32.mrb[30].mxu1  ;;  %1443 = vmatmul.mubr.f32.vlgmr.msra.gmra.mrb[32].mxu1 %v802_v49 }
 0x5ae   :  { %v788_v8 = vpop.f32.mrb[31].mxu1  ;;  %v804_v9 = vsel %vm449_vm2, %v1403_v7, %v691_v3 }
 0x5af   :  { %v803_v10 = vsel %vm449_vm2, %v788_v8, %v690_v44 }
 0x5b0   :  { %1445 = vmatprep.mubr.f32.mxu1 %v803_v10 }
 0x5b1   :  { %1446 = vmatmul.mubr.f32.gmra.mrb[34].mxu1 %v804_v9 }
 0x678   :  { %v1438_v12 = vpop.f32.mrb[16].mxu0 }
 0x679   :  { %v2065_v13 = vadd.f32 %v1438_v12, %v1067_v11  ;;  %v894_v14 = vpop.f32.mrb[17].mxu0 }
 0x67a   :  { %v2068_v16 = vadd.f32 %v1067_v11, %v894_v14 }
 0x67b   :  { %935 = vmax.xlane.f32.xlu0 %v2065_v13 }
 0x67c   :  { %v1441_v15 = vpop.f32.mrb[18].mxu0 }
 0x67d   :  { %v2070_v17 = vadd.f32 %v1441_v15, %v1067_v11  ;;  %v904_v18 = vpop.f32.mrb[19].mxu0 }
 0x67e   :  { %v2074_v19 = vadd.f32 %v1067_v11, %v904_v18 }
 0x67f   :  { %933 = vmax.xlane.f32.xlu0 %v2068_v16  ;;  %939 = vmax.xlane.f32.xlu1 %v2070_v17 }
 0x680   :  { %v1444_v42 = vpop.f32.mrb[32].mxu1 }
 0x681   :  { %v914_v20 = vpop.f32.mrb[33].mxu1  ;;  %v2080_v23 = vadd.f32 %v1444_v42, %v1067_v11 }
 0x682   :  { %v2076_v21 = vadd.f32 %v1067_v11, %v914_v20 }
 0x683   :  { %937 = vmax.xlane.f32.xlu1 %v2074_v19 }
 0x684   :  { %941 = vmax.xlane.f32.xlu0 %v2076_v21  ;;  %v1447_v22 = vpop.f32.mrb[34].mxu1 }
 0x685   :  { %v924_v32 = vpop.f32.mrb[35].mxu1  ;;  %v2086_v25 = vadd.f32 %v1447_v22, %v1067_v11 }
 0x686   :  { %v2082_v24 = vadd.f32 %v1067_v11, %v924_v32 }
 0x687   :  { %943 = vmax.xlane.f32.xlu1 %v2080_v23 }
 0x688   :  { %945 = vmax.xlane.f32.xlu0 %v2082_v24 }
 0x68b   :  { %947 = vmax.xlane.f32.xlu1 %v2086_v25 }
 0x708   :  { %v936_v26 = vpop.xlane.xlu0 %935 }
 0x709   :  { %v950_v27 = vsub.f32 %v2065_v13, %v936_v26 }
 0x70b   :  { %v959_v28 = vmul.f32 1.442695, %v950_v27 }
 0x70c   :  { %v2090_v29 = vpop.xlane.xlu0 %933  ;;  %v2092_v30 = vpop.xlane.xlu1 %939 }
 0x70d   :  { %1631 = vpow2.f32 %v959_v28  ;;  %v949_v31 = vsub.f32 %v2068_v16, %v2090_v29  ;;  %v952_v38 = vsub.f32 %v2070_v17, %v2092_v30 }
 0x70f   :  { %v957_v47 = vmul.f32 1.442695, %v949_v31  ;;  %v963_v52 = vmul.f32 1.442695, %v952_v38 }
 0x710   :  { %v2098_v60 = vpop.xlane.xlu1 %937 }
 0x711   :  { %1633 = vpow2.f32 %v957_v47  ;;  %v951_v61 = vsub.f32 %v2074_v19, %v2098_v60  ;;  %v2102_v62 = vpop.xlane.xlu0 %941 }
 0x712   :  { %1635 = vpow2.f32 %v963_v52  ;;  %v953_v63 = vsub.f32 %v2076_v21, %v2102_v62 }
 0x713   :  { %v961_v33 = vmul.f32 1.442695, %v951_v61 }
 0x714   :  { %v965_v34 = vmul.f32 1.442695, %v953_v63  ;;  %v2106_v35 = vpop.xlane.xlu1 %943 }
 0x715   :  { %1637 = vpow2.f32 %v961_v33  ;;  %v954_v36 = vsub.f32 %v2080_v23, %v2106_v35  ;;  %v2110_v0 = vpop.xlane.xlu0 %945 }
 0x716   :  { %v955_v1 = vsub.f32 %v2082_v24, %v2110_v0  ;;  %1639 = vpow2.f32 %v965_v34 }
 0x717   :  { %v1632_v37 = vpop.eup %1631  ;;  %v967_v39 = vmul.f32 1.442695, %v954_v36 }
 0x718   :  { %v969_v40 = vmul.f32 1.442695, %v955_v1  ;;  %975 = vadd.xlane.f32.xlu1 %v1632_v37  ;;  %v2114_v41 = vpop.xlane.xlu1 %947 }
 0x719   :  { %1641 = vpow2.f32 %v967_v39  ;;  %v956_v2 = vsub.f32 %v2086_v25, %v2114_v41 }
 0x71a   :  { %1643 = vpow2.f32 %v969_v40 }
 0x71b   :  { %v1634_v3 = vpop.eup %1633  ;;  %v971_v43 = vmul.f32 1.442695, %v956_v2 }
 0x71c   :  { %v1636_v44 = vpop.eup %1635  ;;  %973 = vadd.xlane.f32.xlu0 %v1634_v3 }
 0x71d   :  { %1645 = vpow2.f32 %v971_v43  ;;  %979 = vadd.xlane.f32.xlu1 %v1636_v44 }
 0x71f   :  { %v1638_v45 = vpop.eup %1637 }
 0x720   :  { %977 = vadd.xlane.f32.xlu0 %v1638_v45  ;;  %v1640_v53 = vpop.eup %1639 }
 0x723   :  { %v1642_v54 = vpop.eup %1641 }
 0x724   :  { %983 = vadd.xlane.f32.xlu1 %v1642_v54  ;;  %981 = vadd.xlane.f32.xlu0 %v1640_v53  ;;  %v1644_v55 = vpop.eup %1643 }
 0x727   :  { %v1646_v56 = vpop.eup %1645 }
 0x728   :  { %987 = vadd.xlane.f32.xlu1 %v1646_v56  ;;  %985 = vadd.xlane.f32.xlu0 %v1644_v55 }
 0x7a5   :  { %v976_v57 = vpop.xlane.xlu1 %975 }
 0x7a6   :  { %1647 = vlog2.f32 %v976_v57 }
 0x7a9   :  { %v974_v58 = vpop.xlane.xlu0 %973 }
 0x7aa   :  { %v980_v59 = vpop.xlane.xlu1 %979  ;;  %1649 = vlog2.f32 %v974_v58 }
 0x7ab   :  { %1651 = vlog2.f32 %v980_v59 }
 0x7ad   :  { %v978_v46 = vpop.xlane.xlu0 %977 }
 0x7ae   :  { %1653 = vlog2.f32 %v978_v46 }
 0x7b0   :  { %v1648_v4 = vpop.eup %1647 }
 0x7b1   :  { %v992_v5 = vmul.f32 0.6931472, %v1648_v4  ;;  %v984_v48 = vpop.xlane.xlu1 %983  ;;  %v982_v6 = vpop.xlane.xlu0 %981 }
 0x7b2   :  { %1655 = vlog2.f32 %v984_v48 }
 0x7b3   :  { %v1006_v49 = vadd.f32 %v992_v5, %v936_v26  ;;  %1657 = vlog2.f32 %v982_v6 }
 0x7b4   :  { %v1650_v50 = vpop.eup %1649 }
 0x7b5   :  { %v1652_v51 = vpop.eup %1651  ;;  %v1014_v7 = vsub.f32 %v2065_v13, %v1006_v49  ;;  %v990_v8 = vmul.f32 0.6931472, %v1650_v50  ;;  %v988_v9 = vpop.xlane.xlu1 %987 }
 0x7b6   :  { %v986_v10 = vpop.xlane.xlu0 %985  ;;  %v996_v11 = vmul.f32 0.6931472, %v1652_v51  ;;  %1659 = vlog2.f32 %v988_v9 }
 0x7b7   :  { %1022 = vst [vmem:[%s2161_s4 + $0x8] sm:$0xff] %v1014_v7  ;;  %v1005_v12 = vadd.f32 %v990_v8, %v2090_v29  ;;  %1661 = vlog2.f32 %v986_v10 }
 0x7b8   :  { %v1654_v14 = vpop.eup %1653  ;;  %v1008_v15 = vadd.f32 %v996_v11, %v2092_v30 }
 0x7b9   :  { %v1013_v18 = vsub.f32 %v2068_v16, %v1005_v12  ;;  %v994_v42 = vmul.f32 0.6931472, %v1654_v14 }
 0x7ba   :  { %v1016_v13 = vsub.f32 %v2070_v17, %v1008_v15 }
 0x7bb   :  { %1021 = vst [vmem:[%s2161_s4] sm:$0xff] %v1013_v18  ;;  %v1007_v20 = vadd.f32 %v994_v42, %v2098_v60 }
 0x7bc   :  { %v1656_v22 = vpop.eup %1655  ;;  %1024 = vst [vmem:[%s2161_s4 + $0x18] sm:$0xff] %v1016_v13 }
 0x7bd   :  { %v1658_v32 = vpop.eup %1657  ;;  %v1015_v26 = vsub.f32 %v2074_v19, %v1007_v20  ;;  %v1000_v27 = vmul.f32 0.6931472, %v1656_v22 }
 0x7be   :  { %v998_v28 = vmul.f32 0.6931472, %v1658_v32 }
 0x7bf   :  { %1023 = vst [vmem:[%s2161_s4 + $0x10] sm:$0xff] %v1015_v26  ;;  %v1010_v16 = vadd.f32 %v1000_v27, %v2106_v35 }
 0x7c0   :  { %v1660_v17 = vpop.eup %1659  ;;  %v1009_v29 = vadd.f32 %v998_v28, %v2102_v62 }
 0x7c1   :  { %v1662_v30 = vpop.eup %1661  ;;  %v1018_v31 = vsub.f32 %v2080_v23, %v1010_v16  ;;  %v1004_v38 = vmul.f32 0.6931472, %v1660_v17 }
 0x7c2   :  { %v1017_v47 = vsub.f32 %v2076_v21, %v1009_v29  ;;  %v1002_v52 = vmul.f32 0.6931472, %v1662_v30 }
 0x7c3   :  { %1026 = vst [vmem:[%s2161_s4 + $0x28] sm:$0xff] %v1018_v31  ;;  %v1012_v19 = vadd.f32 %v1004_v38, %v2114_v41 }
 0x7c4   :  { %1025 = vst [vmem:[%s2161_s4 + $0x20] sm:$0xff] %v1017_v47  ;;  %v1011_v60 = vadd.f32 %v1002_v52, %v2110_v0 }
 0x7c5   :  { %v1020_v61 = vsub.f32 %v2086_v25, %v1012_v19 }
 0x7c6   :  { %v1019_v23 = vsub.f32 %v2082_v24, %v1011_v60 }
 0x7c7   :  { %1028 = vst [vmem:[%s2161_s4 + $0x38] sm:$0xff] %v1020_v61 }
 0x7c8   :  { %1027 = vst [vmem:[%s2161_s4 + $0x30] sm:$0xff] %v1019_v23 }
 0x7c9   :  { %1033 = vsyncpa [#allocation3], 1 }
 0x7ca   :  { %1034 = vsyncpa [#allocation5], 1 }

</bundles_post_ra>
